<compile_context>
chip_gen: v7x
topology: tpu7x:2x2x1
jax: 0.10.0
libtpu: 0.0.40
codegen_flags: <defaults>
</compile_context>

<pallas_src>
import jax
import jax.numpy as jnp
from jax.experimental import pallas as pl
from jax.experimental.pallas import tpu as pltpu


# ----------------------------------------------------------------------------
# Kernel
# ----------------------------------------------------------------------------
def chomp1d_kernel(x_ref, o_ref):
    """Copy the leading o_ref.shape[-1] lanes of the input tile.

    Lane-tiled path : x_ref (TR, TL), o_ref (TR, TL)   -> slice is a no-op copy.
    Short-L path    : x_ref (TR, L),  o_ref (TR, L_out)-> static leading slice.
    Either way this lowers to a plain contiguous VMEM load/store.
    """
    o_ref[...] = x_ref[:, : o_ref.shape[-1]]


# ----------------------------------------------------------------------------
# Tile selection helpers
# ----------------------------------------------------------------------------
def _sublane_multiple(dtype):
    """Row-tile alignment so packed dtypes fill whole vregs (8/16/32)."""
    itemsize = jnp.dtype(dtype).itemsize
    return max(8, 32 // itemsize)


def _vmem_capacity_bytes():
    """Physical VMEM of the current chip; conservative fallback if unknown."""
    try:
        info = pltpu.get_tpu_info()
        cap = getattr(info, "vmem_capacity_bytes", None)
        if cap:
            return int(cap)
    except Exception:
        pass
    return 64 * 1024 * 1024  # conservative (v7x-sized) fallback


def _pick_tiles(R, L, L_out, dtype):
    """Choose (TR, TL_in, TL_out, lane_grid, vmem_limit_bytes)."""
    itemsize = jnp.dtype(dtype).itemsize
    sub = _sublane_multiple(dtype)

    vmem_cap = _vmem_capacity_bytes()
    # Budget for the 4 double-buffered pipeline buffers (2 in + 2 out):
    # ~16 MiB on v7x (64 MiB physical), ~24 MiB on v5e/v6e (128 MiB physical).
    pipeline_budget = min(vmem_cap // 4, 24 * 1024 * 1024)

    if L_out < 128:
        # Short-length path: full-length blocks (always legal), chomp via
        # the in-kernel leading slice.
        TL_in, TL_out = L, L_out
        lane_grid = 1
    else:
        # Lane-tiled path: 128-multiple tiles; the chomp falls out of the grid
        # extent so the tail past L_out is never DMA'd. Only the final lane
        # tile per row is a (masked) partial store.
        TL = min(2048, (L_out // 128) * 128)
        TL_in = TL_out = TL
        lane_grid = pl.cdiv(L_out, TL)

    # Largest sublane-aligned row tile that keeps 2*(in + out) under budget.
    bytes_per_row = 2 * (TL_in + TL_out) * itemsize
    max_rows = max(1, pipeline_budget // bytes_per_row)
    if R <= max_rows:
        TR = R                                   # full row dim: always legal
    else:
        TR = (max_rows // sub) * sub
        if TR == 0:
            TR = min(R, sub)

    # Scoped-VMEM limit with headroom over the pipeline footprint.
    footprint = 2 * TR * (TL_in + TL_out) * itemsize
    vmem_limit = int(min(vmem_cap // 2, max(32 * 1024 * 1024, footprint + (4 << 20))))

    return TR, TL_in, TL_out, lane_grid, vmem_limit


# ----------------------------------------------------------------------------
# Wrapper
# ----------------------------------------------------------------------------
def chomp1d(x, chomp_size):
    """Pallas TPU equivalent of PyTorch Chomp1d: returns x[:, :, :-chomp_size]."""
    B, C, L = x.shape
    # PyTorch's x[:, :, :-0] would be an empty tensor; we require a real chomp.
    assert 0 < chomp_size < L, "chomp_size must be in (0, L)"
    L_out = L - chomp_size

    # Flatten (B, C) -> rows: free contiguous reshape, gives large uniform
    # sublane-dense tiles and many parallel grid steps.
    R = B * C
    x2 = x.reshape(R, L)

    TR, TL_in, TL_out, lane_grid, vmem_limit = _pick_tiles(R, L, L_out, x.dtype)
    grid = (pl.cdiv(R, TR), lane_grid)

    if lane_grid > 1 or TL_in == TL_out:
        # Lane-tiled path: identical blocks, chomp handled by the grid extent.
        in_spec = pl.BlockSpec((TR, TL_in), lambda r, l: (r, l))
        out_spec = pl.BlockSpec((TR, TL_out), lambda r, l: (r, l))
    else:
        # Short-length path: full-length blocks, chomp via in-kernel slice.
        in_spec = pl.BlockSpec((TR, L), lambda r, l: (r, 0))
        out_spec = pl.BlockSpec((TR, L_out), lambda r, l: (r, 0))

    out2 = pl.pallas_call(
        chomp1d_kernel,
        out_shape=jax.ShapeDtypeStruct((R, L_out), x.dtype),
        grid=grid,
        in_specs=[in_spec],
        out_specs=out_spec,
        compiler_params=pltpu.CompilerParams(
            dimension_semantics=("parallel", "arbitrary"),
            vmem_limit_bytes=vmem_limit,
        ),
    )(x2)

    return out2.reshape(B, C, L_out)


# ----------------------------------------------------------------------------
# main
# ----------------------------------------------------------------------------
if __name__ == "__main__":
    key = jax.random.PRNGKey(0)
    k1, k2, k3 = jax.random.split(key, 3)

    # 1) Small case matching the module usage: (batch=2, channels=4, length=16),
    #    chomp=4 (exercises the short-length, full-block path).
    chomp_small = 4
    x_small = jax.random.normal(k1, (2, 4, 16), jnp.float32)
    out_small = jax.block_until_ready(chomp1d(x_small, chomp_small))
    assert out_small.shape == (2, 4, 16 - chomp_small), out_small.shape
    assert jnp.array_equal(out_small, x_small[:, :, :-chomp_small])
    assert jnp.all(jnp.isfinite(out_small))

    # 2) Longer case exercising the lane-tiled path (L_out >= 128, ragged tail).
    chomp_mid = 3
    x_mid = jax.random.normal(k2, (2, 16, 384), jnp.float32)
    out_mid = jax.block_until_ready(chomp1d(x_mid, chomp_mid))
    assert out_mid.shape == (2, 16, 384 - chomp_mid), out_mid.shape
    assert jnp.array_equal(out_mid, x_mid[:, :, :-chomp_mid])

    # 3) bf16 case exercising the 16-row sublane-packed tiling.
    chomp_bf = 2
    x_bf = jax.random.normal(k3, (2, 32, 256), jnp.float32).astype(jnp.bfloat16)
    out_bf = jax.block_until_ready(chomp1d(x_bf, chomp_bf))
    assert out_bf.shape == (2, 32, 256 - chomp_bf), out_bf.shape
    assert jnp.array_equal(out_bf, x_bf[:, :, :-chomp_bf])

    print("KERNEL_OK")
</pallas_src>

<mosaic_0001>
module attributes {stable_mosaic.version = 11 : i64} {
  func.func @chomp1d_kernel(%arg0: i32, %arg1: i32, %arg2: memref<8x16xf32, #tpu.memory_space<vmem>>, %arg3: memref<8x12xf32, #tpu.memory_space<vmem>>) attributes {dimension_semantics = [#tpu.dimension_semantics<parallel>, #tpu.dimension_semantics<arbitrary>], iteration_bounds = array<i64: 1, 1>, scalar_prefetch = 0 : i64, scratch_operands = 0 : i64, tpu.core_type = #tpu.core_type<tc>, window_params = [{transform_indices = @transform_0, window_bounds = array<i64: 8, 16>}, {transform_indices = @transform_1, window_bounds = array<i64: 8, 12>}]} {
    %c0 = arith.constant 0 : index
    %c0_0 = arith.constant 0 : index
    %0 = vector.load %arg2[%c0, %c0_0] : memref<8x16xf32, #tpu.memory_space<vmem>>, vector<8x12xf32>
    %c0_1 = arith.constant 0 : index
    %c0_2 = arith.constant 0 : index
    %1 = vector.load %arg3[%c0_1, %c0_2] : memref<8x12xf32, #tpu.memory_space<vmem>>, vector<8x12xf32>
    tpu.vector_store %arg3[%c0_1, %c0_2], %0 {strides = array<i32>} : memref<8x12xf32, #tpu.memory_space<vmem>>, vector<8x12xf32>,
    return
  }
  func.func @transform_0(%arg0: i32, %arg1: i32) -> (i32, i32) {
    %c0_i32 = arith.constant 0 : i32
    %c0_i32_0 = arith.constant 0 : i32
    return %arg0, %c0_i32 : i32, i32
  }
  func.func @transform_1(%arg0: i32, %arg1: i32) -> (i32, i32) {
    %c0_i32 = arith.constant 0 : i32
    %c0_i32_0 = arith.constant 0 : i32
    return %arg0, %c0_i32 : i32, i32
  }
}

</mosaic_0001>

<bundles_post_ra>
// kernel: tpu_custom_call.1
= control target key start
LH: loop header
LB: loop body
LE: loop exit
PB: predicated region body
PF: predicated region fallthrough
CT: control target
= control target key end

     0   :  { %6 = vsyncpa [#allocation3], 0  ;;  %s125_s0 = inlined_call_operand.hbm [shape: f32[8,16], index: 0, kind: input, shape index: {}]   ;;  %s126_s1 = inlined_call_operand.hbm [shape: f32[8,12], index: 1, kind: output, shape index: {}]  }
   0x1   :  { %7 = vsyncpa [#allocation4], 0  ;;  %s89_s6 = smov [#allocation2]   ;;  %s41_s10 = scalar_lea.hbm %s125_s0, 128 }
   0x2   :  { %s14_s7 = sshll.u32 %s89_s6, 4  ;;  %p42_p0 = scmp.ne.s32.totalorder %s125_s0, %s41_s10  ;;  %s15_s7 = int_to_ptr.vmem [resolvable:$true] %s14_s7 }
   0x3   :  { %p45_p1 = scmp.lt.u32.totalorder %s41_s10, %s125_s0 }
   0x5   :  { %p47_p2 = pnand %p45_p1, %p42_p0 }
   0x7   :  { %50 = shalt.err (!%p47_p2)
}
   0x8   :  { %s51_s15 = scalar_lea.vmem %s15_s7, 128  ;;  %p56_p4 = scmp.lt.s32.totalorder %s15_s7, %s15_s7 }
   0x9   :  { %p52_p3 = scmp.ne.s32.totalorder %s15_s7, %s51_s15  ;;  %p57_p5 = scmp.lt.s32.totalorder %s51_s15, %s51_s15 }
   0xb   :  { %p58_p6 = por %p57_p5, %p56_p4 }
   0xd   :  { %p59_p7 = pnand %p58_p6, %p52_p3 }
   0xf   :  { %62 = shalt.err (!%p59_p7)
}
  0x10   :  { %17 = dma.hbm_to_vmem [thread:$0]  %s125_s0, 128, %s15_s7, [#allocation3]  }
  0x11   :  { %85 = dma.done.wait [#allocation3], 128  }
  0x12   :  { %86 = vsyncadd [#allocation3], 4294967168  ;;  %s90_s18 = smov [#allocation5]   ;;  %vm22_vm0 = vcmask 97280   ;;  %v21_v0 = vld [vmem:[#allocation2] sm:$0xff] }
  0x13   :  { %s30_s19 = sshll.u32 %s90_s18, 4  ;;  %23 = vst.msk [vmem:[#allocation5] sm:$0xff] %vm22_vm0, %v21_v0  ;;  %s31_s19 = int_to_ptr.vmem [resolvable:$true] %s30_s19 }
  0x14   :  { %s63_s20 = scalar_lea.vmem %s31_s19, 128  ;;  %p68_p9 = scmp.lt.s32.totalorder %s31_s19, %s31_s19 }
  0x15   :  { %p64_p8 = scmp.ne.s32.totalorder %s31_s19, %s63_s20  ;;  %p69_p10 = scmp.lt.s32.totalorder %s63_s20, %s63_s20 }
  0x17   :  { %p70_p11 = por %p69_p10, %p68_p9 }
  0x19   :  { %p71_p12 = pnand %p70_p11, %p64_p8 }
  0x1b   :  { %74 = shalt.err (!%p71_p12)
}
  0x1c   :  { %s75_s23 = scalar_lea.hbm %s126_s1, 128 }
  0x1d   :  { %p76_p13 = scmp.ne.s32.totalorder %s126_s1, %s75_s23  ;;  %p79_p0 = scmp.lt.u32.totalorder %s75_s23, %s126_s1 }
  0x1f   :  { %p81_p1 = pnand %p79_p0, %p76_p13 }
  0x21   :  { %84 = shalt.err (!%p81_p1)
}
  0x22   :  { %33 = dma.vmem_to_hbm [thread:$0]  %s31_s19, 128, %s126_s1, [#allocation4]  }
  0x23   :  { %87 = dma.done.wait [#allocation4], 128  }
  0x24   :  { %88 = vsyncadd [#allocation4], 4294967168 }
  0x25   :  { %37 = vsyncpa [#allocation3], 1 }
  0x26   :  { %38 = vsyncpa [#allocation4], 1 }

</bundles_post_ra>
